<compile_context>
chip_gen: v7x
topology: tpu7x:2x2x1
jax: 0.10.0
libtpu: 0.0.40
codegen_flags: <defaults>
</compile_context>

<pallas_src>
import functools

import jax
import jax.numpy as jnp
from jax import lax
from jax.experimental import pallas as pl
from jax.experimental.pallas import tpu as pltpu


def _round_up(x, m):
    return ((x + m - 1) // m) * m


def _pick_tile(dim_pad, target):
    """Largest multiple of 128 <= target that divides dim_pad (dim_pad % 128 == 0)."""
    t = min(target, dim_pad)
    for cand in range(t, 0, -128):
        if dim_pad % cand == 0:
            return cand
    return 128  # unreachable: 128 always divides dim_pad


# ----------------------------- Pallas kernel -------------------------------- #
def _conv_bn_act_kernel(p_ref, w_ref, s_ref, b_ref, o_ref, acc_ref):
    # p_ref: (TM, TK) bf16 im2col patch tile
    # w_ref: (TK, TN) bf16 reshaped conv-weight tile
    # s_ref: (1, TN)  f32 folded BN scale  = gamma / sqrt(var + eps)
    # b_ref: (1, TN)  f32 folded BN bias   = beta - mean * scale
    # o_ref: (TM, TN) f32 output tile (resident across the K grid axis)
    # acc_ref: (TM, TN) f32 accumulator scratch
    k = pl.program_id(2)

    @pl.when(k == 0)
    def _():
        acc_ref[...] = jnp.zeros_like(acc_ref)

    acc_ref[...] += jnp.dot(p_ref[...], w_ref[...],
                            preferred_element_type=jnp.float32)

    @pl.when(k == pl.num_programs(2) - 1)
    def _():
        y = acc_ref[...] * s_ref[...] + b_ref[...]
        o_ref[...] = jnp.where(y > 0, y, 0.1 * y).astype(o_ref.dtype)


def _gemm_bn_act(patches, w_mat, scale, bias, *, tm_target=512, tk_target=512,
                 tn_target=256):
    """patches: (M, K) bf16, w_mat: (K, C2) bf16, scale/bias: (C2,) f32 -> (M, C2) f32."""
    M, K = patches.shape
    C2 = w_mat.shape[1]

    # Lane-dense padding: K / C2 up to multiples of 128 (dense vregs / MXU columns,
    # unmasked output stores); M up to a multiple of 128 (then of the M tile).
    K_pad = _round_up(K, 128)
    C2_pad = _round_up(C2, 128)
    M_pad0 = _round_up(M, 128)

    tm = _pick_tile(M_pad0, tm_target)
    tk = _pick_tile(K_pad, tk_target)
    tn = _pick_tile(C2_pad, tn_target)
    M_pad = _round_up(M_pad0, tm)

    if (M_pad, K_pad) != (M, K):
        patches = jnp.pad(patches, ((0, M_pad - M), (0, K_pad - K)))
    if (K_pad, C2_pad) != (K, C2):
        w_mat = jnp.pad(w_mat, ((0, K_pad - K), (0, C2_pad - C2)))
    if C2_pad != C2:
        scale = jnp.pad(scale, (0, C2_pad - C2))
        bias = jnp.pad(bias, (0, C2_pad - C2))

    scale2 = scale.reshape(1, C2_pad)
    bias2 = bias.reshape(1, C2_pad)

    grid = (M_pad // tm, C2_pad // tn, K_pad // tk)

    # VMEM budget (double-buffered in/out blocks + accumulator); explicit scoped
    # limit sized to fit all generations (v7x has only 64 MiB physical VMEM).
    est = (2 * (tm * tk + tk * tn) * 2     # bf16 input blocks, double-buffered
           + 2 * tm * tn * 4               # f32 output blocks, double-buffered
           + tm * tn * 4                   # f32 accumulator scratch
           + 4 * 2 * tn * 4)               # scale/bias blocks
    vmem_limit = int(min(max(2 * est, 32 * 1024 * 1024), 56 * 1024 * 1024))

    flops = 2 * M_pad * K_pad * C2_pad
    bytes_accessed = (M_pad * K_pad * 2 + K_pad * C2_pad * 2
                      + M_pad * C2_pad * 4 + 2 * C2_pad * 4)

    out = pl.pallas_call(
        _conv_bn_act_kernel,
        out_shape=jax.ShapeDtypeStruct((M_pad, C2_pad), jnp.float32),
        grid_spec=pltpu.PrefetchScalarGridSpec(
            num_scalar_prefetch=0,
            grid=grid,
            in_specs=[
                pl.BlockSpec((tm, tk), lambda i, j, k: (i, k)),
                pl.BlockSpec((tk, tn), lambda i, j, k: (k, j)),
                pl.BlockSpec((1, tn), lambda i, j, k: (0, j)),
                pl.BlockSpec((1, tn), lambda i, j, k: (0, j)),
            ],
            out_specs=pl.BlockSpec((tm, tn), lambda i, j, k: (i, j)),
            scratch_shapes=[pltpu.VMEM((tm, tn), jnp.float32)],
        ),
        compiler_params=pltpu.CompilerParams(
            dimension_semantics=("parallel", "parallel", "arbitrary"),
            vmem_limit_bytes=vmem_limit),
        cost_estimate=pl.CostEstimate(flops=flops, transcendentals=0,
                                      bytes_accessed=bytes_accessed),
    )(patches, w_mat, scale2, bias2)

    return out[:M, :C2]


# ------------------------------ glue (JAX) ---------------------------------- #
def _im2col_nhwc(x_nhwc, kh, kw, stride, padding, dilation):
    """x_nhwc: (N, H, W, C) -> (N*OH*OW, KH*KW*C) with (kh, kw, c) minor ordering."""
    x = jnp.pad(x_nhwc, ((0, 0), (padding, padding), (padding, padding), (0, 0)))
    N, Hp, Wp, C = x.shape
    eff_kh = dilation * (kh - 1) + 1
    eff_kw = dilation * (kw - 1) + 1
    oh = (Hp - eff_kh) // stride + 1
    ow = (Wp - eff_kw) // stride + 1
    cols = []
    for i in range(kh):
        for j in range(kw):
            cols.append(
                x[:, i * dilation: i * dilation + stride * oh: stride,
                     j * dilation: j * dilation + stride * ow: stride, :])
    patches = jnp.concatenate(cols, axis=-1)          # (N, OH, OW, KH*KW*C)
    return patches.reshape(N * oh * ow, kh * kw * C), oh, ow


def conv_module_forward(x_nchw, weight_oihw, gamma, beta, run_mean, run_var,
                        *, stride=1, padding=0, dilation=1, eps=1e-5):
    """Forward of Conv(c1, c2, k, ...) [non-depthwise path]: conv -> BN -> LeakyReLU(0.1).

    x_nchw:      (N, C1, H, W)      float32
    weight_oihw: (C2, C1, KH, KW)   float32 (PyTorch Conv2d weight layout)
    BN params:   (C2,) each (inference form with running stats).
    Returns:     (N, C2, OH, OW)    float32
    """
    N, C1, H, W = x_nchw.shape
    C2, _, KH, KW = weight_oihw.shape

    # NCHW -> NHWC, cast to bf16 *before* im2col so the patch matrix is produced
    # (and written to HBM) at half the bytes; accumulation stays f32 in-kernel.
    # TODO(synk): fully in-kernel im2col (haloed NHWC DMA + KH*KW accumulation)
    # would remove the im2col HBM round trip entirely; not implemented here.
    x_nhwc = jnp.transpose(x_nchw, (0, 2, 3, 1)).astype(jnp.bfloat16)
    patches, oh, ow = _im2col_nhwc(x_nhwc, KH, KW, stride, padding, dilation)

    # Weight (C2, C1, KH, KW) -> (KH, KW, C1, C2) -> (KH*KW*C1, C2), bf16.
    w_mat = jnp.transpose(weight_oihw, (2, 3, 1, 0)).reshape(KH * KW * C1, C2)
    w_mat = w_mat.astype(jnp.bfloat16)

    # Fold BatchNorm into per-channel scale/bias (kept f32, applied in-kernel).
    scale = (gamma / jnp.sqrt(run_var + eps)).astype(jnp.float32)
    bias = (beta - run_mean * scale).astype(jnp.float32)

    out_flat = _gemm_bn_act(patches, w_mat, scale, bias)

    out = out_flat.reshape(N, oh, ow, C2)
    # TODO(synk): could keep NHWC (optionally bf16) end-to-end if the consumer
    # allowed it; module contract is NCHW f32, so transpose back here.
    return jnp.transpose(out, (0, 3, 1, 2))


# ------------------------------ reference ----------------------------------- #
def _reference(x_nchw, weight_oihw, gamma, beta, run_mean, run_var,
               *, stride, padding, dilation, eps=1e-5):
    y = lax.conv_general_dilated(
        x_nchw, weight_oihw,
        window_strides=(stride, stride),
        padding=[(padding, padding), (padding, padding)],
        rhs_dilation=(dilation, dilation),
        dimension_numbers=("NCHW", "OIHW", "NCHW"))
    scale = (gamma / jnp.sqrt(run_var + eps)).reshape(1, -1, 1, 1)
    bias = (beta - run_mean * gamma / jnp.sqrt(run_var + eps)).reshape(1, -1, 1, 1)
    y = y * scale + bias
    return jnp.where(y > 0, y, 0.1 * y)


# --------------------------------- main -------------------------------------- #
if __name__ == "__main__":
    # Conv(c1=4, c2=8, kernel_size=3, stride=1, padding=1, act='leaky_relu')
    c1, c2, k, stride, padding, dilation = 4, 8, 3, 1, 1, 1
    N, H, W = 2, 16, 16

    key = jax.random.PRNGKey(0)
    kx, kw, kg, kb, km, kv = jax.random.split(key, 6)

    x = jax.random.normal(kx, (N, c1, H, W), dtype=jnp.float32)
    weight = jax.random.normal(kw, (c2, c1, k, k), dtype=jnp.float32) * 0.1
    gamma = 1.0 + 0.1 * jax.random.normal(kg, (c2,), dtype=jnp.float32)
    beta = 0.1 * jax.random.normal(kb, (c2,), dtype=jnp.float32)
    run_mean = 0.1 * jax.random.normal(km, (c2,), dtype=jnp.float32)
    run_var = jnp.abs(jax.random.normal(kv, (c2,), dtype=jnp.float32)) + 0.5

    fwd = jax.jit(functools.partial(conv_module_forward,
                                    stride=stride, padding=padding, dilation=dilation))
    out = fwd(x, weight, gamma, beta, run_mean, run_var)
    jax.block_until_ready(out)

    ref = _reference(x, weight, gamma, beta, run_mean, run_var,
                     stride=stride, padding=padding, dilation=dilation)
    assert out.shape == (N, c2, H, W)
    # bf16 operands (f32 accumulation) -> tolerance loosened vs the pure-f32 version.
    max_err = float(jnp.max(jnp.abs(out - ref)))
    assert jnp.allclose(out, ref, rtol=5e-2, atol=5e-2), max_err

    # TODO(synk): depthwise=True branch (grouped conv + pointwise conv) not implemented;
    # this kernel covers the default (groups=1) path of Conv.
    print("KERNEL_OK")
</pallas_src>

<mosaic_0001>
module attributes {stable_mosaic.version = 11 : i64} {
  func.func @_conv_bn_act_kernel(%arg0: i32, %arg1: i32, %arg2: i32, %arg3: memref<512x128xbf16, #tpu.memory_space<vmem>>, %arg4: memref<128x128xbf16, #tpu.memory_space<vmem>>, %arg5: memref<1x128xf32, #tpu.memory_space<vmem>>, %arg6: memref<1x128xf32, #tpu.memory_space<vmem>>, %arg7: memref<512x128xf32, #tpu.memory_space<vmem>>, %arg8: memref<512x128xf32, #tpu.memory_space<vmem>>) attributes {dimension_semantics = [#tpu.dimension_semantics<parallel>, #tpu.dimension_semantics<parallel>, #tpu.dimension_semantics<arbitrary>], iteration_bounds = array<i64: 1, 1, 1>, scalar_prefetch = 0 : i64, scratch_operands = 1 : i64, tpu.core_type = #tpu.core_type<tc>, window_params = [{transform_indices = @transform_0, window_bounds = array<i64: 512, 128>}, {transform_indices = @transform_1, window_bounds = array<i64: 128, 128>}, {transform_indices = @transform_2, window_bounds = array<i64: 1, 128>}, {transform_indices = @transform_3, window_bounds = array<i64: 1, 128>}, {transform_indices = @transform_4, window_bounds = array<i64: 512, 128>}]} {
    %c0_i32 = arith.constant 0 : i32
    %0 = arith.cmpi eq, %arg2, %c0_i32 : i32
    %1 = arith.extui %0 : i1 to i32
    %c0_i32_0 = arith.constant 0 : i32
    %2 = arith.cmpi ne, %1, %c0_i32_0 : i32
    scf.if %2 {
      %cst_10 = arith.constant 0.000000e+00 : f32
      %12 = vector.broadcast %cst_10 : f32 to vector<512x128xf32>
      %c0_11 = arith.constant 0 : index
      %c0_12 = arith.constant 0 : index
      %13 = vector.load %arg8[%c0_11, %c0_12] : memref<512x128xf32, #tpu.memory_space<vmem>>, vector<512x128xf32>
      tpu.vector_store %arg8[%c0_11, %c0_12], %12 {strides = array<i32>} : memref<512x128xf32, #tpu.memory_space<vmem>>, vector<512x128xf32>,
    } else {
    }
    %c0 = arith.constant 0 : index
    %c0_1 = arith.constant 0 : index
    %3 = vector.load %arg8[%c0, %c0_1] : memref<512x128xf32, #tpu.memory_space<vmem>>, vector<512x128xf32>
    %c0_2 = arith.constant 0 : index
    %c0_3 = arith.constant 0 : index
    %4 = vector.load %arg3[%c0_2, %c0_3] : memref<512x128xbf16, #tpu.memory_space<vmem>>, vector<512x128xbf16>
    %c0_4 = arith.constant 0 : index
    %c0_5 = arith.constant 0 : index
    %5 = vector.load %arg4[%c0_4, %c0_5] : memref<128x128xbf16, #tpu.memory_space<vmem>>, vector<128x128xbf16>
    %cst = arith.constant dense<0.000000e+00> : vector<512x128xf32>
    %6 = tpu.matmul %4, %5, %cst {dimension_numbers = #tpu.dot_dimension_numbers<[1], [0], [0], [1], [0, 0, 1, 1], [], []>} : vector<512x128xbf16>, vector<128x128xbf16>, vector<512x128xf32> -> vector<512x128xf32>
    %7 = arith.addf %3, %6 : vector<512x128xf32>
    %c0_6 = arith.constant 0 : index
    %c0_7 = arith.constant 0 : index
    %8 = vector.load %arg8[%c0_6, %c0_7] : memref<512x128xf32, #tpu.memory_space<vmem>>, vector<512x128xf32>
    tpu.vector_store %arg8[%c0_6, %c0_7], %7 {strides = array<i32>} : memref<512x128xf32, #tpu.memory_space<vmem>>, vector<512x128xf32>,
    %c0_i32_8 = arith.constant 0 : i32
    %9 = arith.cmpi eq, %arg2, %c0_i32_8 : i32
    %10 = arith.extui %9 : i1 to i32
    %c0_i32_9 = arith.constant 0 : i32
    %11 = arith.cmpi ne, %10, %c0_i32_9 : i32
    scf.if %11 {
      %c0_10 = arith.constant 0 : index
      %c0_11 = arith.constant 0 : index
      %12 = vector.load %arg8[%c0_10, %c0_11] : memref<512x128xf32, #tpu.memory_space<vmem>>, vector<512x128xf32>
      %c0_12 = arith.constant 0 : index
      %c0_13 = arith.constant 0 : index
      %13 = vector.load %arg5[%c0_12, %c0_13] : memref<1x128xf32, #tpu.memory_space<vmem>>, vector<1x128xf32>
      %14 = vector.broadcast %13 : vector<1x128xf32> to vector<512x128xf32>
      %15 = arith.mulf %12, %14 : vector<512x128xf32>
      %c0_14 = arith.constant 0 : index
      %c0_15 = arith.constant 0 : index
      %16 = vector.load %arg6[%c0_14, %c0_15] : memref<1x128xf32, #tpu.memory_space<vmem>>, vector<1x128xf32>
      %17 = vector.broadcast %16 : vector<1x128xf32> to vector<512x128xf32>
      %18 = arith.addf %15, %17 : vector<512x128xf32>
      %cst_16 = arith.constant 0.000000e+00 : f32
      %19 = vector.broadcast %cst_16 : f32 to vector<512x128xf32>
      %20 = arith.cmpf ogt, %18, %19 : vector<512x128xf32>
      %cst_17 = arith.constant 1.000000e-01 : f32
      %21 = vector.broadcast %cst_17 : f32 to vector<512x128xf32>
      %22 = arith.mulf %21, %18 : vector<512x128xf32>
      %23 = arith.select %20, %18, %22 : vector<512x128xi1>, vector<512x128xf32>
      %c0_18 = arith.constant 0 : index
      %c0_19 = arith.constant 0 : index
      %24 = vector.load %arg7[%c0_18, %c0_19] : memref<512x128xf32, #tpu.memory_space<vmem>>, vector<512x128xf32>
      tpu.vector_store %arg7[%c0_18, %c0_19], %23 {strides = array<i32>} : memref<512x128xf32, #tpu.memory_space<vmem>>, vector<512x128xf32>,
    } else {
    }
    return
  }
  func.func @transform_0(%arg0: i32, %arg1: i32, %arg2: i32) -> (i32, i32) {
    %c0_i32 = arith.constant 0 : i32
    return %arg0, %arg2 : i32, i32
  }
  func.func @transform_1(%arg0: i32, %arg1: i32, %arg2: i32) -> (i32, i32) {
    %c0_i32 = arith.constant 0 : i32
    return %arg2, %arg1 : i32, i32
  }
  func.func @transform_2(%arg0: i32, %arg1: i32, %arg2: i32) -> (i32, i32) {
    %c0_i32 = arith.constant 0 : i32
    %c0_i32_0 = arith.constant 0 : i32
    return %c0_i32, %arg1 : i32, i32
  }
  func.func @transform_3(%arg0: i32, %arg1: i32, %arg2: i32) -> (i32, i32) {
    %c0_i32 = arith.constant 0 : i32
    %c0_i32_0 = arith.constant 0 : i32
    return %c0_i32, %arg1 : i32, i32
  }
  func.func @transform_4(%arg0: i32, %arg1: i32, %arg2: i32) -> (i32, i32) {
    %c0_i32 = arith.constant 0 : i32
    return %arg0, %arg1 : i32, i32
  }
}

</mosaic_0001>

<bundles_post_ra>
// kernel: conv_module_forward.1
= control target key start
LH: loop header
LB: loop body
LE: loop exit
PB: predicated region body
PF: predicated region fallthrough
CT: control target
= control target key end

     0   :  { %s2079_s1 = inlined_call_operand.vmem [shape: bf16[128,128], index: 1, kind: input, shape index: {}]   ;;  %s2080_s0 = inlined_call_operand.vmem [shape: bf16[512,128], index: 0, kind: input, shape index: {}]   ;;  %s2081_s2 = inlined_call_operand.vmem [shape: f32[1,128], index: 2, kind: input, shape index: {}]   ;;  %s2082_s3 = inlined_call_operand.vmem [shape: f32[1,128], index: 3, kind: input, shape index: {}]   ;;  %s2083_s4 = inlined_call_operand.vmem [shape: f32[512,128], index: 4, kind: output, shape index: {}]  }
   0x1   :  { %v1534_v0 = vld [vmem:[%s2079_s1] sm:$0xff]   ;;  %v1535_v1 = vld [vmem:[%s2079_s1 + $0x8] sm:$0xff]   ;;  %v1536_v2 = vld [vmem:[%s2079_s1 + $0x10] sm:$0xff]  }
   0x2   :  { %1438 = vmatprep.subr.bf16.mxu0 %v1534_v0  ;;  %1518 = vmatprep.subr.bf16.mxu1 %v1534_v0  ;;  %v1537_v3 = vld [vmem:[%s2079_s1 + $0x18] sm:$0xff]   ;;  %v1542_v4 = vld [vmem:[%s2080_s0] sm:$0xff]   ;;  %v1539_v7 = vld [vmem:[%s2079_s1 + $0x28] sm:$0xff]  }
   0x3   :  { %1439 = vmatpush3.bf16.msra.mxu0 %v1534_v0  ;;  %1526 = vmatpush3.bf16.msra.mxu1 %v1534_v0  ;;  %v1543_v5 = vld [vmem:[%s2080_s0 + $0x80] sm:$0xff]   ;;  %v1540_v8 = vld [vmem:[%s2079_s1 + $0x30] sm:$0xff]   ;;  %v1541_v9 = vld [vmem:[%s2079_s1 + $0x38] sm:$0xff]  }
   0x4   :  { %1440 = vmatprep.subr.bf16.mxu0 %v1535_v1  ;;  %1519 = vmatprep.subr.bf16.mxu1 %v1535_v1  ;;  %v1538_v6 = vld [vmem:[%s2079_s1 + $0x20] sm:$0xff]   ;;  %v1544_v10 = vld [vmem:[%s2080_s0 + $0x8] sm:$0xff]   ;;  %v1546_v12 = vld [vmem:[%s2080_s0 + $0x10] sm:$0xff]  }
   0x5   :  { %1454 = vmatprep.mubr.bf16.mxu0 %v1542_v4  ;;  %1486 = vmatprep.mubr.bf16.mxu1 %v1543_v5  ;;  %v1545_v11 = vld [vmem:[%s2080_s0 + $0x88] sm:$0xff]   ;;  %v1547_v13 = vld [vmem:[%s2080_s0 + $0x90] sm:$0xff]   ;;  %v1548_v14 = vld [vmem:[%s2080_s0 + $0x18] sm:$0xff]  }
   0x6   :  { %v1549_v15 = vld [vmem:[%s2080_s0 + $0x98] sm:$0xff]   ;;  %v1550_v16 = vld [vmem:[%s2080_s0 + $0x20] sm:$0xff]   ;;  %v1552_v18 = vld [vmem:[%s2080_s0 + $0x28] sm:$0xff]  }
   0x7   :  { %1441 = vmatpush3.bf16.msra.mxu0 %v1535_v1  ;;  %1527 = vmatpush3.bf16.msra.mxu1 %v1535_v1  ;;  %v1551_v17 = vld [vmem:[%s2080_s0 + $0xa0] sm:$0xff]   ;;  %v1553_v19 = vld [vmem:[%s2080_s0 + $0xa8] sm:$0xff]   ;;  %v1554_v20 = vld [vmem:[%s2080_s0 + $0x30] sm:$0xff]  }
   0x8   :  { %1442 = vmatprep.subr.bf16.mxu0 %v1536_v2  ;;  %1520 = vmatprep.subr.bf16.mxu1 %v1536_v2  ;;  %v1555_v21 = vld [vmem:[%s2080_s0 + $0xb0] sm:$0xff]   ;;  %v1556_v22 = vld [vmem:[%s2080_s0 + $0x38] sm:$0xff]   ;;  %v1558_v24 = vld [vmem:[%s2080_s0 + $0x40] sm:$0xff]  }
   0x9   :  { %v1557_v23 = vld [vmem:[%s2080_s0 + $0xb8] sm:$0xff]   ;;  %v1559_v25 = vld [vmem:[%s2080_s0 + $0xc0] sm:$0xff]   ;;  %v1560_v26 = vld [vmem:[%s2080_s0 + $0x48] sm:$0xff]  }
   0xa   :  { %v1561_v27 = vld [vmem:[%s2080_s0 + $0xc8] sm:$0xff]   ;;  %v1562_v28 = vld [vmem:[%s2080_s0 + $0x50] sm:$0xff]   ;;  %v1564_v30 = vld [vmem:[%s2080_s0 + $0x58] sm:$0xff]  }
   0xb   :  { %1443 = vmatpush3.bf16.msra.mxu0 %v1536_v2  ;;  %1528 = vmatpush3.bf16.msra.mxu1 %v1536_v2  ;;  %v1563_v29 = vld [vmem:[%s2080_s0 + $0xd0] sm:$0xff]   ;;  %v1565_v31 = vld [vmem:[%s2080_s0 + $0xd8] sm:$0xff]   ;;  %v1566_v32 = vld [vmem:[%s2080_s0 + $0x60] sm:$0xff]  }
   0xc   :  { %1444 = vmatprep.subr.bf16.mxu0 %v1537_v3  ;;  %1521 = vmatprep.subr.bf16.mxu1 %v1537_v3  ;;  %v1567_v33 = vld [vmem:[%s2080_s0 + $0xe0] sm:$0xff]   ;;  %v1568_v34 = vld [vmem:[%s2080_s0 + $0x68] sm:$0xff]   ;;  %v1570_v36 = vld [vmem:[%s2080_s0 + $0x70] sm:$0xff]  }
   0xd   :  { %v1569_v35 = vld [vmem:[%s2080_s0 + $0xe8] sm:$0xff]   ;;  %v1571_v37 = vld [vmem:[%s2080_s0 + $0xf0] sm:$0xff]   ;;  %v1572_v38 = vld [vmem:[%s2080_s0 + $0x78] sm:$0xff]  }
   0xe   :  { %v1573_v39 = vld [vmem:[%s2080_s0 + $0xf8] sm:$0xff]   ;;  %v1722_v40 = vld [vmem:[%s2081_s2] ss:$0 sm:$0xff] }
   0xf   :  { %1445 = vmatpush3.bf16.msra.mxu0 %v1537_v3  ;;  %1529 = vmatpush3.bf16.msra.mxu1 %v1537_v3  ;;  %v1727_v42 = vld [vmem:[%s2082_s3] ss:$0 sm:$0xff] }
  0x10   :  { %1446 = vmatprep.subr.bf16.mxu0 %v1538_v6  ;;  %1522 = vmatprep.subr.bf16.mxu1 %v1538_v6 }
  0x13   :  { %1447 = vmatpush3.bf16.msra.mxu0 %v1538_v6  ;;  %1530 = vmatpush3.bf16.msra.mxu1 %v1538_v6 }
  0x14   :  { %1448 = vmatprep.subr.bf16.mxu0 %v1539_v7  ;;  %1523 = vmatprep.subr.bf16.mxu1 %v1539_v7 }
  0x17   :  { %1449 = vmatpush3.bf16.msra.mxu0 %v1539_v7  ;;  %1531 = vmatpush3.bf16.msra.mxu1 %v1539_v7 }
  0x18   :  { %1450 = vmatprep.subr.bf16.mxu0 %v1540_v8  ;;  %1524 = vmatprep.subr.bf16.mxu1 %v1540_v8 }
  0x1b   :  { %1451 = vmatpush3.bf16.msra.mxu0 %v1540_v8  ;;  %1532 = vmatpush3.bf16.msra.mxu1 %v1540_v8 }
  0x1c   :  { %1452 = vmatprep.subr.bf16.mxu0 %v1541_v9  ;;  %1525 = vmatprep.subr.bf16.mxu1 %v1541_v9 }
  0x1f   :  { %1453 = vmatpush3.bf16.msra.mxu0 %v1541_v9  ;;  %1533 = vmatpush3.bf16.msra.mxu1 %v1541_v9 }
  0x22   :  { %1455 = vmatmul.mubr.bf16.vlgmr.msra.gmra.mrb[0].mxu0 %v1544_v10  ;;  %1487 = vmatmul.mubr.bf16.vlgmr.msra.gmra.mrb[0].mxu1 %v1545_v11 }
  0x23   :  { %1458 = vmatprep.mubr.bf16.mxu0 %v1546_v12  ;;  %1490 = vmatprep.mubr.bf16.mxu1 %v1547_v13 }
  0x2a   :  { %1459 = vmatmul.mubr.bf16.gmra.mrb[4].mxu0 %v1548_v14  ;;  %1491 = vmatmul.mubr.bf16.gmra.mrb[4].mxu1 %v1549_v15 }
  0x2b   :  { %1462 = vmatprep.mubr.bf16.mxu0 %v1550_v16  ;;  %1494 = vmatprep.mubr.bf16.mxu1 %v1551_v17 }
  0x32   :  { %1463 = vmatmul.mubr.bf16.gmra.mrb[8].mxu0 %v1552_v18  ;;  %1495 = vmatmul.mubr.bf16.gmra.mrb[8].mxu1 %v1553_v19 }
  0x33   :  { %1466 = vmatprep.mubr.bf16.mxu0 %v1554_v20  ;;  %1498 = vmatprep.mubr.bf16.mxu1 %v1555_v21 }
  0x3a   :  { %1467 = vmatmul.mubr.bf16.gmra.mrb[12].mxu0 %v1556_v22  ;;  %1499 = vmatmul.mubr.bf16.gmra.mrb[12].mxu1 %v1557_v23 }
  0x3b   :  { %1470 = vmatprep.mubr.bf16.mxu0 %v1558_v24  ;;  %1502 = vmatprep.mubr.bf16.mxu1 %v1559_v25 }
  0x42   :  { %1471 = vmatmul.mubr.bf16.gmra.mrb[16].mxu0 %v1560_v26  ;;  %1503 = vmatmul.mubr.bf16.gmra.mrb[16].mxu1 %v1561_v27 }
  0x43   :  { %1474 = vmatprep.mubr.bf16.mxu0 %v1562_v28  ;;  %1506 = vmatprep.mubr.bf16.mxu1 %v1563_v29 }
  0x4a   :  { %1475 = vmatmul.mubr.bf16.gmra.mrb[20].mxu0 %v1564_v30  ;;  %1507 = vmatmul.mubr.bf16.gmra.mrb[20].mxu1 %v1565_v31 }
  0x4b   :  { %1478 = vmatprep.mubr.bf16.mxu0 %v1566_v32  ;;  %1510 = vmatprep.mubr.bf16.mxu1 %v1567_v33 }
  0x52   :  { %1479 = vmatmul.mubr.bf16.gmra.mrb[24].mxu0 %v1568_v34  ;;  %1511 = vmatmul.mubr.bf16.gmra.mrb[24].mxu1 %v1569_v35 }
  0x53   :  { %1482 = vmatprep.mubr.bf16.mxu0 %v1570_v36  ;;  %1514 = vmatprep.mubr.bf16.mxu1 %v1571_v37 }
  0x5a   :  { %1483 = vmatmul.mubr.bf16.gmra.mrb[28].mxu0 %v1572_v38  ;;  %1515 = vmatmul.mubr.bf16.gmra.mrb[28].mxu1 %v1573_v39 }
  0xf5   :  { %v1456_v41 = vpop.f32.mrb[0].mxu0  ;;  %v1488_v43 = vpop.f32.mrb[0].mxu1 }
  0xf6   :  { %v963_v44 = vmul.f32 %v1456_v41, %v1722_v40  ;;  %v995_v45 = vmul.f32 %v1488_v43, %v1722_v40  ;;  %v504_v46 = vpop.f32.mrb[1].mxu0  ;;  %v632_v47 = vpop.f32.mrb[1].mxu1 }
  0xf7   :  { %v961_v48 = vmul.f32 %v1722_v40, %v504_v46  ;;  %v993_v49 = vmul.f32 %v1722_v40, %v632_v47  ;;  %v1457_v50 = vpop.f32.mrb[2].mxu0  ;;  %v1489_v51 = vpop.f32.mrb[2].mxu1 }
  0xf8   :  { %v1034_v52 = vadd.f32 %v1727_v42, %v963_v44  ;;  %v1066_v53 = vadd.f32 %v1727_v42, %v995_v45  ;;  %v964_v54 = vmul.f32 %v1457_v50, %v1722_v40  ;;  %v996_v55 = vmul.f32 %v1489_v51, %v1722_v40  ;;  %v507_v56 = vpop.f32.mrb[3].mxu0  ;;  %v635_v57 = vpop.f32.mrb[3].mxu1 }
  0xf9   :  { %v1032_v58 = vadd.f32 %v1727_v42, %v961_v48  ;;  %v1064_v59 = vadd.f32 %v1727_v42, %v993_v49  ;;  %v962_v60 = vmul.f32 %v1722_v40, %v507_v56  ;;  %v994_v61 = vmul.f32 %v1722_v40, %v635_v57 }
  0xfa   :  { %vm1098_vm0 = vcmp.gt.f32.partialorder %v1034_v52, 0.0  ;;  %v1162_v62 = vmul.f32 0.1, %v1034_v52  ;;  %vm1130_vm1 = vcmp.gt.f32.partialorder %v1066_v53, 0.0  ;;  %v1194_v63 = vmul.f32 0.1, %v1066_v53 }
  0xfb   :  { %vm1096_vm2 = vcmp.gt.f32.partialorder %v1032_v58, 0.0  ;;  %v1160_v0 = vmul.f32 0.1, %v1032_v58  ;;  %vm1128_vm3 = vcmp.gt.f32.partialorder %v1064_v59, 0.0  ;;  %v1192_v1 = vmul.f32 0.1, %v1064_v59 }
  0xfc   :  { %v1226_v2 = vsel %vm1098_vm0, %v1034_v52, %v1162_v62  ;;  %v1258_v3 = vsel %vm1130_vm1, %v1066_v53, %v1194_v63  ;;  %v1035_v4 = vadd.f32 %v1727_v42, %v964_v54  ;;  %v1067_v5 = vadd.f32 %v1727_v42, %v996_v55 }
  0xfd   :  { %1290 = vst [vmem:[%s2083_s4 + $0x10] sm:$0xff] %v1226_v2  ;;  %1322 = vst [vmem:[%s2083_s4 + $0x110] sm:$0xff] %v1258_v3  ;;  %v1224_v6 = vsel %vm1096_vm2, %v1032_v58, %v1160_v0  ;;  %v1256_v7 = vsel %vm1128_vm3, %v1064_v59, %v1192_v1  ;;  %v1033_v8 = vadd.f32 %v1727_v42, %v962_v60  ;;  %v1460_v10 = vpop.f32.mrb[4].mxu0  ;;  %v1492_v11 = vpop.f32.mrb[4].mxu1 }
  0xfe   :  { %v1065_v9 = vadd.f32 %v1727_v42, %v994_v61  ;;  %1288 = vst [vmem:[%s2083_s4] sm:$0xff] %v1224_v6  ;;  %1320 = vst [vmem:[%s2083_s4 + $0x100] sm:$0xff] %v1256_v7  ;;  %vm1099_vm4 = vcmp.gt.f32.partialorder %v1035_v4, 0.0  ;;  %v1163_v12 = vmul.f32 0.1, %v1035_v4  ;;  %vm1131_vm5 = vcmp.gt.f32.partialorder %v1067_v5, 0.0  ;;  %v520_v20 = vpop.f32.mrb[5].mxu0 }
  0xff   :  { %v1195_v13 = vmul.f32 0.1, %v1067_v5  ;;  %vm1097_vm6 = vcmp.gt.f32.partialorder %v1033_v8, 0.0  ;;  %v1161_v14 = vmul.f32 0.1, %v1033_v8  ;;  %v967_v18 = vmul.f32 %v1460_v10, %v1722_v40  ;;  %v648_v21 = vpop.f32.mrb[5].mxu1 }
 0x100   :  { %vm1129_vm7 = vcmp.gt.f32.partialorder %v1065_v9, 0.0  ;;  %v1193_v15 = vmul.f32 0.1, %v1065_v9  ;;  %v1227_v16 = vsel %vm1099_vm4, %v1035_v4, %v1163_v12  ;;  %v999_v19 = vmul.f32 %v1492_v11, %v1722_v40  ;;  %v1461_v26 = vpop.f32.mrb[6].mxu0  ;;  %v1493_v27 = vpop.f32.mrb[6].mxu1 }
 0x101   :  { %v1259_v17 = vsel %vm1131_vm5, %v1067_v5, %v1195_v13  ;;  %1291 = vst [vmem:[%s2083_s4 + $0x18] sm:$0xff] %v1227_v16  ;;  %v1225_v22 = vsel %vm1097_vm6, %v1033_v8, %v1161_v14  ;;  %v965_v24 = vmul.f32 %v1722_v40, %v520_v20  ;;  %v997_v25 = vmul.f32 %v1722_v40, %v648_v21  ;;  %v523_v32 = vpop.f32.mrb[7].mxu0  ;;  %v651_v33 = vpop.f32.mrb[7].mxu1 }
 0x102   :  { %1323 = vst [vmem:[%s2083_s4 + $0x118] sm:$0xff] %v1259_v17  ;;  %v1257_v23 = vsel %vm1129_vm7, %v1065_v9, %v1193_v15  ;;  %1289 = vst [vmem:[%s2083_s4 + $0x8] sm:$0xff] %v1225_v22  ;;  %v1038_v28 = vadd.f32 %v1727_v42, %v967_v18  ;;  %v1070_v29 = vadd.f32 %v1727_v42, %v999_v19 }
 0x103   :  { %1321 = vst [vmem:[%s2083_s4 + $0x108] sm:$0xff] %v1257_v23  ;;  %v968_v30 = vmul.f32 %v1461_v26, %v1722_v40  ;;  %v1000_v31 = vmul.f32 %v1493_v27, %v1722_v40  ;;  %v1036_v34 = vadd.f32 %v1727_v42, %v965_v24  ;;  %v1068_v35 = vadd.f32 %v1727_v42, %v997_v25 }
 0x104   :  { %v966_v36 = vmul.f32 %v1722_v40, %v523_v32  ;;  %v998_v37 = vmul.f32 %v1722_v40, %v651_v33  ;;  %vm1102_vm8 = vcmp.gt.f32.partialorder %v1038_v28, 0.0  ;;  %v1166_v38 = vmul.f32 0.1, %v1038_v28 }
 0x105   :  { %vm1134_vm9 = vcmp.gt.f32.partialorder %v1070_v29, 0.0  ;;  %v1198_v39 = vmul.f32 0.1, %v1070_v29  ;;  %vm1100_vm10 = vcmp.gt.f32.partialorder %v1036_v34, 0.0  ;;  %v1164_v41 = vmul.f32 0.1, %v1036_v34 }
 0x106   :  { %vm1132_vm11 = vcmp.gt.f32.partialorder %v1068_v35, 0.0  ;;  %v1196_v43 = vmul.f32 0.1, %v1068_v35  ;;  %v1230_v44 = vsel %vm1102_vm8, %v1038_v28, %v1166_v38  ;;  %v1039_v46 = vadd.f32 %v1727_v42, %v968_v30  ;;  %v1464_v48 = vpop.f32.mrb[8].mxu0  ;;  %v1496_v49 = vpop.f32.mrb[8].mxu1 }
 0x107   :  { %v1262_v45 = vsel %vm1134_vm9, %v1070_v29, %v1198_v39  ;;  %v1071_v47 = vadd.f32 %v1727_v42, %v1000_v31  ;;  %1294 = vst [vmem:[%s2083_s4 + $0x30] sm:$0xff] %v1230_v44  ;;  %v1228_v50 = vsel %vm1100_vm10, %v1036_v34, %v1164_v41  ;;  %v1037_v52 = vadd.f32 %v1727_v42, %v966_v36  ;;  %v536_v54 = vpop.f32.mrb[9].mxu0  ;;  %v664_v55 = vpop.f32.mrb[9].mxu1 }
 0x108   :  { %1326 = vst [vmem:[%s2083_s4 + $0x130] sm:$0xff] %v1262_v45  ;;  %v1260_v51 = vsel %vm1132_vm11, %v1068_v35, %v1196_v43  ;;  %v1069_v53 = vadd.f32 %v1727_v42, %v998_v37  ;;  %1292 = vst [vmem:[%s2083_s4 + $0x20] sm:$0xff] %v1228_v50  ;;  %vm1103_vm12 = vcmp.gt.f32.partialorder %v1039_v46, 0.0  ;;  %v1167_v56 = vmul.f32 0.1, %v1039_v46  ;;  %v1465_v0 = vpop.f32.mrb[10].mxu0 }
 0x109   :  { %1324 = vst [vmem:[%s2083_s4 + $0x120] sm:$0xff] %v1260_v51  ;;  %vm1135_vm13 = vcmp.gt.f32.partialorder %v1071_v47, 0.0  ;;  %v1199_v57 = vmul.f32 0.1, %v1071_v47  ;;  %vm1101_vm14 = vcmp.gt.f32.partialorder %v1037_v52, 0.0  ;;  %v971_v62 = vmul.f32 %v1464_v48, %v1722_v40  ;;  %v1497_v1 = vpop.f32.mrb[10].mxu1 }
 0x10a   :  { %v1165_v58 = vmul.f32 0.1, %v1037_v52  ;;  %vm1133_vm15 = vcmp.gt.f32.partialorder %v1069_v53, 0.0  ;;  %v1197_v59 = vmul.f32 0.1, %v1069_v53  ;;  %v1231_v60 = vsel %vm1103_vm12, %v1039_v46, %v1167_v56  ;;  %v539_v6 = vpop.f32.mrb[11].mxu0 }
 0x10b   :  { %v1263_v61 = vsel %vm1135_vm13, %v1071_v47, %v1199_v57  ;;  %v1003_v63 = vmul.f32 %v1496_v49, %v1722_v40  ;;  %1295 = vst [vmem:[%s2083_s4 + $0x38] sm:$0xff] %v1231_v60  ;;  %v969_v4 = vmul.f32 %v1722_v40, %v536_v54  ;;  %v1001_v5 = vmul.f32 %v1722_v40, %v664_v55  ;;  %v667_v7 = vpop.f32.mrb[11].mxu1 }
 0x10c   :  { %1327 = vst [vmem:[%s2083_s4 + $0x138] sm:$0xff] %v1263_v61  ;;  %v1229_v2 = vsel %vm1101_vm14, %v1037_v52, %v1165_v58  ;;  %v1261_v3 = vsel %vm1133_vm15, %v1069_v53, %v1197_v59  ;;  %v1042_v8 = vadd.f32 %v1727_v42, %v971_v62  ;;  %v972_v10 = vmul.f32 %v1465_v0, %v1722_v40 }
 0x10d   :  { %1293 = vst [vmem:[%s2083_s4 + $0x28] sm:$0xff] %v1229_v2  ;;  %1325 = vst [vmem:[%s2083_s4 + $0x128] sm:$0xff] %v1261_v3  ;;  %v1074_v9 = vadd.f32 %v1727_v42, %v1003_v63  ;;  %v1004_v11 = vmul.f32 %v1497_v1, %v1722_v40  ;;  %v1040_v12 = vadd.f32 %v1727_v42, %v969_v4  ;;  %v1468_v16 = vpop.f32.mrb[12].mxu0  ;;  %v1500_v17 = vpop.f32.mrb[12].mxu1 }
 0x10e   :  { %v1072_v13 = vadd.f32 %v1727_v42, %v1001_v5  ;;  %v970_v14 = vmul.f32 %v1722_v40, %v539_v6  ;;  %v1002_v15 = vmul.f32 %v1722_v40, %v667_v7  ;;  %vm1106_vm0 = vcmp.gt.f32.partialorder %v1042_v8, 0.0  ;;  %v552_v26 = vpop.f32.mrb[13].mxu0  ;;  %v680_v27 = vpop.f32.mrb[13].mxu1 }
 0x10f   :  { %v1170_v18 = vmul.f32 0.1, %v1042_v8  ;;  %vm1138_vm1 = vcmp.gt.f32.partialorder %v1074_v9, 0.0  ;;  %v1202_v19 = vmul.f32 0.1, %v1074_v9  ;;  %vm1104_vm2 = vcmp.gt.f32.partialorder %v1040_v12, 0.0 }
 0x110   :  { %v1168_v20 = vmul.f32 0.1, %v1040_v12  ;;  %vm1136_vm3 = vcmp.gt.f32.partialorder %v1072_v13, 0.0  ;;  %v1200_v21 = vmul.f32 0.1, %v1072_v13  ;;  %v1043_v24 = vadd.f32 %v1727_v42, %v972_v10  ;;  %v1469_v32 = vpop.f32.mrb[14].mxu0 }
 0x111   :  { %v1234_v22 = vsel %vm1106_vm0, %v1042_v8, %v1170_v18  ;;  %v1266_v23 = vsel %vm1138_vm1, %v1074_v9, %v1202_v19  ;;  %v1075_v25 = vadd.f32 %v1727_v42, %v1004_v11  ;;  %v1041_v30 = vadd.f32 %v1727_v42, %v970_v14  ;;  %v1501_v33 = vpop.f32.mrb[14].mxu1  ;;  %v555_v44 = vpop.f32.mrb[15].mxu0 }
 0x112   :  { %1298 = vst [vmem:[%s2083_s4 + $0x50] sm:$0xff] %v1234_v22  ;;  %1330 = vst [vmem:[%s2083_s4 + $0x150] sm:$0xff] %v1266_v23  ;;  %v1232_v28 = vsel %vm1104_vm2, %v1040_v12, %v1168_v20  ;;  %v1264_v29 = vsel %vm1136_vm3, %v1072_v13, %v1200_v21  ;;  %v1073_v31 = vadd.f32 %v1727_v42, %v1002_v15  ;;  %vm1107_vm4 = vcmp.gt.f32.partialorder %v1043_v24, 0.0  ;;  %v683_v45 = vpop.f32.mrb[15].mxu1 }
 0x113   :  { %1296 = vst [vmem:[%s2083_s4 + $0x40] sm:$0xff] %v1232_v28  ;;  %1328 = vst [vmem:[%s2083_s4 + $0x140] sm:$0xff] %v1264_v29  ;;  %v1171_v34 = vmul.f32 0.1, %v1043_v24  ;;  %vm1139_vm5 = vcmp.gt.f32.partialorder %v1075_v25, 0.0  ;;  %vm1105_vm6 = vcmp.gt.f32.partialorder %v1041_v30, 0.0  ;;  %v975_v41 = vmul.f32 %v1468_v16, %v1722_v40 }
 0x114   :  { %v1203_v35 = vmul.f32 0.1, %v1075_v25  ;;  %v1169_v36 = vmul.f32 0.1, %v1041_v30  ;;  %vm1137_vm7 = vcmp.gt.f32.partialorder %v1073_v31, 0.0  ;;  %v1007_v43 = vmul.f32 %v1500_v17, %v1722_v40 }
 0x115   :  { %v1201_v37 = vmul.f32 0.1, %v1073_v31  ;;  %v1235_v38 = vsel %vm1107_vm4, %v1043_v24, %v1171_v34  ;;  %v973_v48 = vmul.f32 %v1722_v40, %v552_v26  ;;  %v1005_v49 = vmul.f32 %v1722_v40, %v680_v27  ;;  %v1472_v50 = vpop.f32.mrb[16].mxu0  ;;  %v1504_v51 = vpop.f32.mrb[16].mxu1 }
 0x116   :  { %v1267_v39 = vsel %vm1139_vm5, %v1075_v25, %v1203_v35  ;;  %1299 = vst [vmem:[%s2083_s4 + $0x58] sm:$0xff] %v1235_v38  ;;  %v1233_v46 = vsel %vm1105_vm6, %v1041_v30, %v1169_v36  ;;  %v1046_v52 = vadd.f32 %v1727_v42, %v975_v41  ;;  %v1078_v53 = vadd.f32 %v1727_v42, %v1007_v43  ;;  %v568_v56 = vpop.f32.mrb[17].mxu0  ;;  %v696_v57 = vpop.f32.mrb[17].mxu1 }
 0x117   :  { %1331 = vst [vmem:[%s2083_s4 + $0x158] sm:$0xff] %v1267_v39  ;;  %v1265_v47 = vsel %vm1137_vm7, %v1073_v31, %v1201_v37  ;;  %1297 = vst [vmem:[%s2083_s4 + $0x48] sm:$0xff] %v1233_v46  ;;  %v976_v54 = vmul.f32 %v1469_v32, %v1722_v40  ;;  %v1008_v55 = vmul.f32 %v1501_v33, %v1722_v40  ;;  %v1473_v62 = vpop.f32.mrb[18].mxu0  ;;  %v1505_v63 = vpop.f32.mrb[18].mxu1 }
 0x118   :  { %1329 = vst [vmem:[%s2083_s4 + $0x148] sm:$0xff] %v1265_v47  ;;  %v1044_v58 = vadd.f32 %v1727_v42, %v973_v48  ;;  %v1076_v59 = vadd.f32 %v1727_v42, %v1005_v49  ;;  %v974_v60 = vmul.f32 %v1722_v40, %v555_v44  ;;  %v1006_v61 = vmul.f32 %v1722_v40, %v683_v45  ;;  %v571_v8 = vpop.f32.mrb[19].mxu0  ;;  %v699_v9 = vpop.f32.mrb[19].mxu1 }
 0x119   :  { %vm1110_vm8 = vcmp.gt.f32.partialorder %v1046_v52, 0.0  ;;  %v1174_v0 = vmul.f32 0.1, %v1046_v52  ;;  %vm1142_vm9 = vcmp.gt.f32.partialorder %v1078_v53, 0.0  ;;  %v1206_v1 = vmul.f32 0.1, %v1078_v53 }
 0x11a   :  { %vm1108_vm10 = vcmp.gt.f32.partialorder %v1044_v58, 0.0  ;;  %v1172_v2 = vmul.f32 0.1, %v1044_v58  ;;  %vm1140_vm11 = vcmp.gt.f32.partialorder %v1076_v59, 0.0  ;;  %v1204_v3 = vmul.f32 0.1, %v1076_v59 }
 0x11b   :  { %v1238_v4 = vsel %vm1110_vm8, %v1046_v52, %v1174_v0  ;;  %v1270_v5 = vsel %vm1142_vm9, %v1078_v53, %v1206_v1  ;;  %v1047_v6 = vadd.f32 %v1727_v42, %v976_v54  ;;  %v1079_v7 = vadd.f32 %v1727_v42, %v1008_v55 }
 0x11c   :  { %1302 = vst [vmem:[%s2083_s4 + $0x70] sm:$0xff] %v1238_v4  ;;  %1334 = vst [vmem:[%s2083_s4 + $0x170] sm:$0xff] %v1270_v5  ;;  %v1236_v10 = vsel %vm1108_vm10, %v1044_v58, %v1172_v2  ;;  %v1268_v11 = vsel %vm1140_vm11, %v1076_v59, %v1204_v3  ;;  %v1045_v12 = vadd.f32 %v1727_v42, %v974_v60 }
 0x11d   :  { %v1077_v13 = vadd.f32 %v1727_v42, %v1006_v61  ;;  %1300 = vst [vmem:[%s2083_s4 + $0x60] sm:$0xff] %v1236_v10  ;;  %1332 = vst [vmem:[%s2083_s4 + $0x160] sm:$0xff] %v1268_v11  ;;  %vm1111_vm12 = vcmp.gt.f32.partialorder %v1047_v6, 0.0  ;;  %v1175_v14 = vmul.f32 0.1, %v1047_v6  ;;  %vm1143_vm13 = vcmp.gt.f32.partialorder %v1079_v7, 0.0 }
 0x11e   :  { %v1207_v15 = vmul.f32 0.1, %v1079_v7  ;;  %vm1109_vm14 = vcmp.gt.f32.partialorder %v1045_v12, 0.0  ;;  %v1173_v16 = vmul.f32 0.1, %v1045_v12  ;;  %v979_v20 = vmul.f32 %v1472_v50, %v1722_v40  ;;  %v1476_v22 = vpop.f32.mrb[20].mxu0 }
 0x11f   :  { %vm1141_vm15 = vcmp.gt.f32.partialorder %v1077_v13, 0.0  ;;  %v1205_v17 = vmul.f32 0.1, %v1077_v13  ;;  %v1239_v18 = vsel %vm1111_vm12, %v1047_v6, %v1175_v14  ;;  %v1011_v21 = vmul.f32 %v1504_v51, %v1722_v40  ;;  %v1508_v23 = vpop.f32.mrb[20].mxu1  ;;  %v584_v28 = vpop.f32.mrb[21].mxu0 }
 0x120   :  { %v1271_v19 = vsel %vm1143_vm13, %v1079_v7, %v1207_v15  ;;  %1303 = vst [vmem:[%s2083_s4 + $0x78] sm:$0xff] %v1239_v18  ;;  %v1237_v24 = vsel %vm1109_vm14, %v1045_v12, %v1173_v16  ;;  %v977_v26 = vmul.f32 %v1722_v40, %v568_v56  ;;  %v1009_v27 = vmul.f32 %v1722_v40, %v696_v57  ;;  %v712_v29 = vpop.f32.mrb[21].mxu1  ;;  %v1477_v34 = vpop.f32.mrb[22].mxu0 }
 0x121   :  { %1335 = vst [vmem:[%s2083_s4 + $0x178] sm:$0xff] %v1271_v19  ;;  %v1269_v25 = vsel %vm1141_vm15, %v1077_v13, %v1205_v17  ;;  %1301 = vst [vmem:[%s2083_s4 + $0x68] sm:$0xff] %v1237_v24  ;;  %v1050_v30 = vadd.f32 %v1727_v42, %v979_v20  ;;  %v1082_v31 = vadd.f32 %v1727_v42, %v1011_v21  ;;  %v1509_v35 = vpop.f32.mrb[22].mxu1  ;;  %v587_v41 = vpop.f32.mrb[23].mxu0 }
 0x122   :  { %1333 = vst [vmem:[%s2083_s4 + $0x168] sm:$0xff] %v1269_v25  ;;  %v980_v32 = vmul.f32 %v1473_v62, %v1722_v40  ;;  %v1012_v33 = vmul.f32 %v1505_v63, %v1722_v40  ;;  %v1048_v36 = vadd.f32 %v1727_v42, %v977_v26  ;;  %v1080_v37 = vadd.f32 %v1727_v42, %v1009_v27  ;;  %v715_v43 = vpop.f32.mrb[23].mxu1 }
 0x123   :  { %v978_v38 = vmul.f32 %v1722_v40, %v571_v8  ;;  %v1010_v39 = vmul.f32 %v1722_v40, %v699_v9  ;;  %vm1114_vm0 = vcmp.gt.f32.partialorder %v1050_v30, 0.0  ;;  %v1178_v44 = vmul.f32 0.1, %v1050_v30 }
 0x124   :  { %vm1146_vm1 = vcmp.gt.f32.partialorder %v1082_v31, 0.0  ;;  %v1210_v45 = vmul.f32 0.1, %v1082_v31  ;;  %vm1112_vm2 = vcmp.gt.f32.partialorder %v1048_v36, 0.0  ;;  %v1176_v46 = vmul.f32 0.1, %v1048_v36 }
 0x125   :  { %vm1144_vm3 = vcmp.gt.f32.partialorder %v1080_v37, 0.0  ;;  %v1208_v47 = vmul.f32 0.1, %v1080_v37  ;;  %v1242_v48 = vsel %vm1114_vm0, %v1050_v30, %v1178_v44  ;;  %v1051_v50 = vadd.f32 %v1727_v42, %v980_v32  ;;  %v1911_v56 = vpop.f32.mrb[24].mxu0  ;;  %v1913_v57 = vpop.f32.mrb[24].mxu1 }
 0x126   :  { %v1274_v49 = vsel %vm1146_vm1, %v1082_v31, %v1210_v45  ;;  %v1083_v51 = vadd.f32 %v1727_v42, %v1012_v33  ;;  %1306 = vst [vmem:[%s2083_s4 + $0x90] sm:$0xff] %v1242_v48  ;;  %v1240_v52 = vsel %vm1112_vm2, %v1048_v36, %v1176_v46  ;;  %v1049_v54 = vadd.f32 %v1727_v42, %v978_v38  ;;  %v1923_v2 = vpop.f32.mrb[25].mxu0  ;;  %v1925_v3 = vpop.f32.mrb[25].mxu1 }
 0x127   :  { %1338 = vst [vmem:[%s2083_s4 + $0x190] sm:$0xff] %v1274_v49  ;;  %v1272_v53 = vsel %vm1144_vm3, %v1080_v37, %v1208_v47  ;;  %v1081_v55 = vadd.f32 %v1727_v42, %v1010_v39  ;;  %1304 = vst [vmem:[%s2083_s4 + $0x80] sm:$0xff] %v1240_v52  ;;  %vm1115_vm4 = vcmp.gt.f32.partialorder %v1051_v50, 0.0  ;;  %v1179_v58 = vmul.f32 0.1, %v1051_v50  ;;  %v1935_v8 = vpop.f32.mrb[26].mxu0 }
 0x128   :  { %1336 = vst [vmem:[%s2083_s4 + $0x180] sm:$0xff] %v1272_v53  ;;  %vm1147_vm5 = vcmp.gt.f32.partialorder %v1083_v51, 0.0  ;;  %v1211_v59 = vmul.f32 0.1, %v1083_v51  ;;  %vm1113_vm6 = vcmp.gt.f32.partialorder %v1049_v54, 0.0  ;;  %v983_v0 = vmul.f32 %v1476_v22, %v1722_v40  ;;  %v1937_v9 = vpop.f32.mrb[26].mxu1 }
 0x129   :  { %v1177_v60 = vmul.f32 0.1, %v1049_v54  ;;  %vm1145_vm7 = vcmp.gt.f32.partialorder %v1081_v55, 0.0  ;;  %v1209_v61 = vmul.f32 0.1, %v1081_v55  ;;  %v1243_v62 = vsel %vm1115_vm4, %v1051_v50, %v1179_v58  ;;  %v603_v14 = vpop.f32.mrb[27].mxu0 }
 0x12a   :  { %v1275_v63 = vsel %vm1147_vm5, %v1083_v51, %v1211_v59  ;;  %v1015_v1 = vmul.f32 %v1508_v23, %v1722_v40  ;;  %1307 = vst [vmem:[%s2083_s4 + $0x98] sm:$0xff] %v1243_v62  ;;  %v981_v6 = vmul.f32 %v1722_v40, %v584_v28  ;;  %v1013_v7 = vmul.f32 %v1722_v40, %v712_v29  ;;  %v731_v15 = vpop.f32.mrb[27].mxu1 }
 0x12b   :  { %1339 = vst [vmem:[%s2083_s4 + $0x198] sm:$0xff] %v1275_v63  ;;  %v1241_v4 = vsel %vm1113_vm6, %v1049_v54, %v1177_v60  ;;  %v1273_v5 = vsel %vm1145_vm7, %v1081_v55, %v1209_v61  ;;  %v1054_v10 = vadd.f32 %v1727_v42, %v983_v0  ;;  %v984_v12 = vmul.f32 %v1477_v34, %v1722_v40 }
 0x12c   :  { %1305 = vst [vmem:[%s2083_s4 + $0x88] sm:$0xff] %v1241_v4  ;;  %1337 = vst [vmem:[%s2083_s4 + $0x188] sm:$0xff] %v1273_v5  ;;  %v1086_v11 = vadd.f32 %v1727_v42, %v1015_v1  ;;  %v1016_v13 = vmul.f32 %v1509_v35, %v1722_v40  ;;  %v1052_v16 = vadd.f32 %v1727_v42, %v981_v6 }
 0x12d   :  { %v1084_v17 = vadd.f32 %v1727_v42, %v1013_v7  ;;  %v982_v18 = vmul.f32 %v1722_v40, %v587_v41  ;;  %v1014_v19 = vmul.f32 %v1722_v40, %v715_v43  ;;  %vm1118_vm8 = vcmp.gt.f32.partialorder %v1054_v10, 0.0  ;;  %v1955_v28 = vpop.f32.mrb[28].mxu0  ;;  %v1957_v29 = vpop.f32.mrb[28].mxu1 }
 0x12e   :  { %v1182_v20 = vmul.f32 0.1, %v1054_v10  ;;  %vm1150_vm9 = vcmp.gt.f32.partialorder %v1086_v11, 0.0  ;;  %v1214_v21 = vmul.f32 0.1, %v1086_v11  ;;  %vm1116_vm10 = vcmp.gt.f32.partialorder %v1052_v16, 0.0 }
 0x12f   :  { %v1180_v22 = vmul.f32 0.1, %v1052_v16  ;;  %vm1148_vm11 = vcmp.gt.f32.partialorder %v1084_v17, 0.0  ;;  %v1212_v23 = vmul.f32 0.1, %v1084_v17  ;;  %v1055_v26 = vadd.f32 %v1727_v42, %v984_v12  ;;  %v1967_v34 = vpop.f32.mrb[29].mxu0 }
 0x130   :  { %v1246_v24 = vsel %vm1118_vm8, %v1054_v10, %v1182_v20  ;;  %v1278_v25 = vsel %vm1150_vm9, %v1086_v11, %v1214_v21  ;;  %v1087_v27 = vadd.f32 %v1727_v42, %v1016_v13  ;;  %v1053_v32 = vadd.f32 %v1727_v42, %v982_v18  ;;  %v1969_v35 = vpop.f32.mrb[29].mxu1  ;;  %v1485_v46 = vpop.f32.mrb[30].mxu0 }
 0x131   :  { %1310 = vst [vmem:[%s2083_s4 + $0xb0] sm:$0xff] %v1246_v24  ;;  %1342 = vst [vmem:[%s2083_s4 + $0x1b0] sm:$0xff] %v1278_v25  ;;  %v1244_v30 = vsel %vm1116_vm10, %v1052_v16, %v1180_v22  ;;  %v1276_v31 = vsel %vm1148_vm11, %v1084_v17, %v1212_v23  ;;  %v1085_v33 = vadd.f32 %v1727_v42, %v1014_v19  ;;  %vm1119_vm12 = vcmp.gt.f32.partialorder %v1055_v26, 0.0  ;;  %v1517_v47 = vpop.f32.mrb[30].mxu1  ;;  %v619_v52 = vpop.f32.mrb[31].mxu0 }
 0x132   :  { %1308 = vst [vmem:[%s2083_s4 + $0xa0] sm:$0xff] %v1244_v30  ;;  %1340 = vst [vmem:[%s2083_s4 + $0x1a0] sm:$0xff] %v1276_v31  ;;  %v1183_v36 = vmul.f32 0.1, %v1055_v26  ;;  %vm1151_vm13 = vcmp.gt.f32.partialorder %v1087_v27, 0.0  ;;  %vm1117_vm14 = vcmp.gt.f32.partialorder %v1053_v32, 0.0  ;;  %v987_v44 = vmul.f32 %v1911_v56, %v1722_v40 }
 0x133   :  { %v1215_v37 = vmul.f32 0.1, %v1087_v27  ;;  %v1181_v38 = vmul.f32 0.1, %v1053_v32  ;;  %vm1149_vm15 = vcmp.gt.f32.partialorder %v1085_v33, 0.0  ;;  %v1019_v45 = vmul.f32 %v1913_v57, %v1722_v40  ;;  %v747_v53 = vpop.f32.mrb[31].mxu1 }
 0x134   :  { %v1213_v39 = vmul.f32 0.1, %v1085_v33  ;;  %v1247_v41 = vsel %vm1119_vm12, %v1055_v26, %v1183_v36  ;;  %v985_v50 = vmul.f32 %v1722_v40, %v1923_v2  ;;  %v1017_v51 = vmul.f32 %v1722_v40, %v1925_v3 }
 0x135   :  { %v1279_v43 = vsel %vm1151_vm13, %v1087_v27, %v1215_v37  ;;  %1311 = vst [vmem:[%s2083_s4 + $0xb8] sm:$0xff] %v1247_v41  ;;  %v1245_v48 = vsel %vm1117_vm14, %v1053_v32, %v1181_v38  ;;  %v1058_v54 = vadd.f32 %v1727_v42, %v987_v44  ;;  %v1090_v55 = vadd.f32 %v1727_v42, %v1019_v45 }
 0x136   :  { %1343 = vst [vmem:[%s2083_s4 + $0x1b8] sm:$0xff] %v1279_v43  ;;  %v1277_v49 = vsel %vm1149_vm15, %v1085_v33, %v1213_v39  ;;  %1309 = vst [vmem:[%s2083_s4 + $0xa8] sm:$0xff] %v1245_v48  ;;  %v988_v56 = vmul.f32 %v1935_v8, %v1722_v40  ;;  %v1020_v57 = vmul.f32 %v1937_v9, %v1722_v40 }
 0x137   :  { %1341 = vst [vmem:[%s2083_s4 + $0x1a8] sm:$0xff] %v1277_v49  ;;  %v1056_v58 = vadd.f32 %v1727_v42, %v985_v50  ;;  %v1088_v59 = vadd.f32 %v1727_v42, %v1017_v51  ;;  %v986_v60 = vmul.f32 %v1722_v40, %v603_v14  ;;  %v1018_v61 = vmul.f32 %v1722_v40, %v731_v15 }
 0x138   :  { %vm1122_vm0 = vcmp.gt.f32.partialorder %v1058_v54, 0.0  ;;  %v1186_v62 = vmul.f32 0.1, %v1058_v54  ;;  %vm1154_vm1 = vcmp.gt.f32.partialorder %v1090_v55, 0.0  ;;  %v1218_v63 = vmul.f32 0.1, %v1090_v55 }
 0x139   :  { %vm1120_vm2 = vcmp.gt.f32.partialorder %v1056_v58, 0.0  ;;  %v1184_v0 = vmul.f32 0.1, %v1056_v58  ;;  %vm1152_vm3 = vcmp.gt.f32.partialorder %v1088_v59, 0.0  ;;  %v1216_v1 = vmul.f32 0.1, %v1088_v59 }
 0x13a   :  { %v1250_v2 = vsel %vm1122_vm0, %v1058_v54, %v1186_v62  ;;  %v1282_v3 = vsel %vm1154_vm1, %v1090_v55, %v1218_v63  ;;  %v1059_v4 = vadd.f32 %v1727_v42, %v988_v56  ;;  %v1091_v5 = vadd.f32 %v1727_v42, %v1020_v57 }
 0x13b   :  { %1314 = vst [vmem:[%s2083_s4 + $0xd0] sm:$0xff] %v1250_v2  ;;  %1346 = vst [vmem:[%s2083_s4 + $0x1d0] sm:$0xff] %v1282_v3  ;;  %v1248_v6 = vsel %vm1120_vm2, %v1056_v58, %v1184_v0  ;;  %v1280_v7 = vsel %vm1152_vm3, %v1088_v59, %v1216_v1  ;;  %v1057_v8 = vadd.f32 %v1727_v42, %v986_v60 }
 0x13c   :  { %v1089_v9 = vadd.f32 %v1727_v42, %v1018_v61  ;;  %1312 = vst [vmem:[%s2083_s4 + $0xc0] sm:$0xff] %v1248_v6  ;;  %1344 = vst [vmem:[%s2083_s4 + $0x1c0] sm:$0xff] %v1280_v7  ;;  %vm1123_vm4 = vcmp.gt.f32.partialorder %v1059_v4, 0.0  ;;  %v1187_v10 = vmul.f32 0.1, %v1059_v4  ;;  %vm1155_vm5 = vcmp.gt.f32.partialorder %v1091_v5, 0.0 }
 0x13d   :  { %v1219_v11 = vmul.f32 0.1, %v1091_v5  ;;  %vm1121_vm6 = vcmp.gt.f32.partialorder %v1057_v8, 0.0  ;;  %v1185_v12 = vmul.f32 0.1, %v1057_v8  ;;  %v991_v16 = vmul.f32 %v1955_v28, %v1722_v40 }
 0x13e   :  { %vm1153_vm7 = vcmp.gt.f32.partialorder %v1089_v9, 0.0  ;;  %v1217_v13 = vmul.f32 0.1, %v1089_v9  ;;  %v1251_v14 = vsel %vm1123_vm4, %v1059_v4, %v1187_v10  ;;  %v1023_v17 = vmul.f32 %v1957_v29, %v1722_v40 }
 0x13f   :  { %v1283_v15 = vsel %vm1155_vm5, %v1091_v5, %v1219_v11  ;;  %1315 = vst [vmem:[%s2083_s4 + $0xd8] sm:$0xff] %v1251_v14  ;;  %v1249_v18 = vsel %vm1121_vm6, %v1057_v8, %v1185_v12  ;;  %v989_v20 = vmul.f32 %v1722_v40, %v1967_v34  ;;  %v1021_v21 = vmul.f32 %v1722_v40, %v1969_v35 }
 0x140   :  { %1347 = vst [vmem:[%s2083_s4 + $0x1d8] sm:$0xff] %v1283_v15  ;;  %v1281_v19 = vsel %vm1153_vm7, %v1089_v9, %v1217_v13  ;;  %1313 = vst [vmem:[%s2083_s4 + $0xc8] sm:$0xff] %v1249_v18  ;;  %v1062_v22 = vadd.f32 %v1727_v42, %v991_v16  ;;  %v1094_v23 = vadd.f32 %v1727_v42, %v1023_v17 }
 0x141   :  { %1345 = vst [vmem:[%s2083_s4 + $0x1c8] sm:$0xff] %v1281_v19  ;;  %v992_v24 = vmul.f32 %v1485_v46, %v1722_v40  ;;  %v1024_v25 = vmul.f32 %v1517_v47, %v1722_v40  ;;  %v1060_v26 = vadd.f32 %v1727_v42, %v989_v20  ;;  %v1092_v27 = vadd.f32 %v1727_v42, %v1021_v21 }
 0x142   :  { %v990_v28 = vmul.f32 %v1722_v40, %v619_v52  ;;  %v1022_v29 = vmul.f32 %v1722_v40, %v747_v53  ;;  %vm1126_vm8 = vcmp.gt.f32.partialorder %v1062_v22, 0.0  ;;  %v1190_v30 = vmul.f32 0.1, %v1062_v22 }
 0x143   :  { %vm1158_vm9 = vcmp.gt.f32.partialorder %v1094_v23, 0.0  ;;  %v1222_v31 = vmul.f32 0.1, %v1094_v23  ;;  %vm1124_vm10 = vcmp.gt.f32.partialorder %v1060_v26, 0.0  ;;  %v1188_v32 = vmul.f32 0.1, %v1060_v26 }
 0x144   :  { %vm1156_vm11 = vcmp.gt.f32.partialorder %v1092_v27, 0.0  ;;  %v1220_v33 = vmul.f32 0.1, %v1092_v27  ;;  %v1254_v34 = vsel %vm1126_vm8, %v1062_v22, %v1190_v30  ;;  %v1063_v36 = vadd.f32 %v1727_v42, %v992_v24 }
 0x145   :  { %v1286_v35 = vsel %vm1158_vm9, %v1094_v23, %v1222_v31  ;;  %v1095_v37 = vadd.f32 %v1727_v42, %v1024_v25  ;;  %1318 = vst [vmem:[%s2083_s4 + $0xf0] sm:$0xff] %v1254_v34  ;;  %v1252_v40 = vsel %vm1124_vm10, %v1060_v26, %v1188_v32  ;;  %v1061_v39 = vadd.f32 %v1727_v42, %v990_v28 }
 0x146   :  { %1350 = vst [vmem:[%s2083_s4 + $0x1f0] sm:$0xff] %v1286_v35  ;;  %v1284_v38 = vsel %vm1156_vm11, %v1092_v27, %v1220_v33  ;;  %v1093_v41 = vadd.f32 %v1727_v42, %v1022_v29  ;;  %1316 = vst [vmem:[%s2083_s4 + $0xe0] sm:$0xff] %v1252_v40  ;;  %vm1127_vm12 = vcmp.gt.f32.partialorder %v1063_v36, 0.0  ;;  %v1191_v43 = vmul.f32 0.1, %v1063_v36 }
 0x147   :  { %1348 = vst [vmem:[%s2083_s4 + $0x1e0] sm:$0xff] %v1284_v38  ;;  %vm1159_vm13 = vcmp.gt.f32.partialorder %v1095_v37, 0.0  ;;  %v1223_v44 = vmul.f32 0.1, %v1095_v37  ;;  %vm1125_vm14 = vcmp.gt.f32.partialorder %v1061_v39, 0.0 }
 0x148   :  { %v1189_v45 = vmul.f32 0.1, %v1061_v39  ;;  %vm1157_vm15 = vcmp.gt.f32.partialorder %v1093_v41, 0.0  ;;  %v1221_v46 = vmul.f32 0.1, %v1093_v41  ;;  %v1255_v47 = vsel %vm1127_vm12, %v1063_v36, %v1191_v43 }
 0x149   :  { %v1287_v48 = vsel %vm1159_vm13, %v1095_v37, %v1223_v44  ;;  %1319 = vst [vmem:[%s2083_s4 + $0xf8] sm:$0xff] %v1255_v47 }
 0x14a   :  { %1351 = vst [vmem:[%s2083_s4 + $0x1f8] sm:$0xff] %v1287_v48  ;;  %v1253_v42 = vsel %vm1125_vm14, %v1061_v39, %v1189_v45  ;;  %v1285_v49 = vsel %vm1157_vm15, %v1093_v41, %v1221_v46 }
 0x14b   :  { %1317 = vst [vmem:[%s2083_s4 + $0xe8] sm:$0xff] %v1253_v42  ;;  %1349 = vst [vmem:[%s2083_s4 + $0x1e8] sm:$0xff] %v1285_v49 }

</bundles_post_ra>
